<compile_context>
chip_gen: v7x
topology: tpu7x:2x2x1
jax: 0.10.0
libtpu: 0.0.40
codegen_flags: <defaults>
</compile_context>

<pallas_src>
import jax
import jax.numpy as jnp
from jax.experimental import pallas as pl
from jax.experimental.pallas import tpu as pltpu


def regression_head_kernel(x_ref, w1_ref, b1_ref, w2_ref, b2_ref, o_ref, acc_ref):
    # x: [tm, tk] (input dtype), w1: [tk, H_pad] bf16, b1: [1, H_pad] f32,
    # w2: [H_pad, L_pad] bf16, b2: [1, L_pad] f32, o: [tm, L_pad], acc: [tm, H_pad] f32
    k = pl.program_id(1)

    @pl.when(k == 0)
    def _():
        acc_ref[...] = jnp.zeros_like(acc_ref)

    # dense: accumulate x @ W1 on the MXU (bf16 operands, f32 accumulation).
    acc_ref[...] += jnp.dot(
        x_ref[...].astype(w1_ref.dtype), w1_ref[...],
        preferred_element_type=jnp.float32)

    @pl.when(k == pl.num_programs(1) - 1)
    def _():
        # bias-add + tanh in f32 (EUP); dropout = identity (eval mode).
        h = jnp.tanh(acc_ref[...] + b1_ref[...])
        # out_proj: bf16 operands, f32 accumulation; padded label columns store zeros.
        out = jnp.dot(h.astype(w2_ref.dtype), w2_ref[...],
                      preferred_element_type=jnp.float32) + b2_ref[...]
        o_ref[...] = out.astype(o_ref.dtype)


def prepare_regression_head_params(w_dense, b_dense, w_out, b_out,
                                   *, compute_dtype=jnp.bfloat16):
    """One-time (model-load) prep. Weights expected in [in, out] layout (PyTorch W.T)."""
    H = w_dense.shape[0]
    L = w_out.shape[1]
    H_pad = max(128, pl.cdiv(H, 128) * 128)
    L_pad = max(128, pl.cdiv(L, 128) * 128)
    w1 = jnp.zeros((H_pad, H_pad), compute_dtype).at[:H, :H].set(
        w_dense.astype(compute_dtype))
    b1 = jnp.zeros((1, H_pad), jnp.float32).at[0, :H].set(b_dense.astype(jnp.float32))
    w2 = jnp.zeros((H_pad, L_pad), compute_dtype).at[:H, :L].set(
        w_out.astype(compute_dtype))
    b2 = jnp.zeros((1, L_pad), jnp.float32).at[0, :L].set(b_out.astype(jnp.float32))
    return dict(w1=w1, b1=b1, w2=w2, b2=b2, H=H, L=L, H_pad=H_pad, L_pad=L_pad)


def regression_head(features, params, *, block_rows=512,
                    w1_vmem_budget_bytes=12 * (1 << 20)):
    """features: [B, H] -> [B, num_labels].

    block_rows: batch rows per grid step (multiple of 8). 512 is a good default
    everywhere; 1024 is fine on v5e/v6e (128 MiB VMEM), keep 256-512 on v7x (64 MiB).
    """
    B, H = features.shape
    assert H == params["H"], "feature dim does not match prepared weights"
    H_pad, L_pad, L = params["H_pad"], params["L_pad"], params["L"]
    out_dtype = features.dtype

    # Lane-align the feature dim only if H itself is not 128-aligned (no-op at
    # realistic hidden sizes; weights were already padded once at load time).
    if H != H_pad:
        features = jnp.zeros((B, H_pad), features.dtype).at[:, :H].set(features)

    # ---- batch tile: multiple of 8 sublanes; >= 2 grid blocks when B >= 16 so the
    # "parallel" axis can feed both v7x TensorCores. No explicit batch padding:
    # Pallas masks the partial last block.
    if B <= block_rows:
        tm = min(block_rows, max(8, pl.cdiv(pl.cdiv(B, 2), 8) * 8))
    else:
        tm = block_rows
    num_blocks = pl.cdiv(B, tm)

    # ---- K-tiling of the dense matmul: split H_pad into lane-aligned chunks only if
    # a full W1 tile would exceed the VMEM budget (v7x-relevant at large H).
    w_itemsize = jnp.dtype(params["w1"].dtype).itemsize
    blocks_128 = H_pad // 128
    num_k = 1
    while ((H_pad // num_k) * H_pad * w_itemsize > w1_vmem_budget_bytes
           and blocks_128 % (num_k * 2) == 0):
        num_k *= 2
    tk = H_pad // num_k

    # ---- BlockSpecs ----
    x_spec = pl.BlockSpec((tm, tk), lambda i, k: (i, k))
    if num_k == 1:
        # constant block index -> single-buffer (double-buffering would only double VMEM)
        w1_spec = pl.BlockSpec((tk, H_pad), lambda i, k: (k, 0),
                               pipeline_mode=pl.Buffered(1))
    else:
        w1_spec = pl.BlockSpec((tk, H_pad), lambda i, k: (k, 0))
    b1_spec = pl.BlockSpec((1, H_pad), lambda i, k: (0, 0), pipeline_mode=pl.Buffered(1))
    w2_spec = pl.BlockSpec((H_pad, L_pad), lambda i, k: (0, 0),
                           pipeline_mode=pl.Buffered(1))
    b2_spec = pl.BlockSpec((1, L_pad), lambda i, k: (0, 0), pipeline_mode=pl.Buffered(1))
    out_spec = pl.BlockSpec((tm, L_pad), lambda i, k: (i, 0))

    # ---- VMEM budget (explicit scoped limit; default scoped limit is what OOMs first)
    x_itemsize = jnp.dtype(features.dtype).itemsize
    o_itemsize = jnp.dtype(out_dtype).itemsize
    vmem_needed = (
        2 * tm * tk * x_itemsize                                   # x tile, double-buffered
        + (1 if num_k == 1 else 2) * tk * H_pad * w_itemsize       # W1
        + H_pad * L_pad * w_itemsize                               # W2 resident
        + (H_pad + L_pad) * 4                                      # biases (f32)
        + 2 * tm * L_pad * o_itemsize                              # output tile
        + tm * H_pad * 4                                           # f32 accumulator scratch
    )
    vmem_limit = int(min(max(int(vmem_needed * 1.3) + (2 << 20), 16 << 20), 64 << 20))

    cost = pl.CostEstimate(
        flops=2 * B * H_pad * (H_pad + L_pad),
        transcendentals=B * H_pad,
        bytes_accessed=(features.size * x_itemsize
                        + params["w1"].size * w_itemsize
                        + params["w2"].size * w_itemsize
                        + (params["b1"].size + params["b2"].size) * 4
                        + B * L_pad * o_itemsize),
    )

    out_padded = pl.pallas_call(
        regression_head_kernel,
        out_shape=jax.ShapeDtypeStruct((B, L_pad), out_dtype),
        grid_spec=pltpu.PrefetchScalarGridSpec(
            num_scalar_prefetch=0,
            grid=(num_blocks, num_k),
            in_specs=[x_spec, w1_spec, b1_spec, w2_spec, b2_spec],
            out_specs=out_spec,
            scratch_shapes=[pltpu.VMEM((tm, H_pad), jnp.float32)],
        ),
        compiler_params=pltpu.CompilerParams(
            dimension_semantics=("parallel", "arbitrary"),
            vmem_limit_bytes=vmem_limit),
        cost_estimate=cost,
    )(features, params["w1"], params["b1"], params["w2"], params["b2"])

    # slice the real labels back out (lane padding only; batch was never padded)
    return out_padded[:, :L]


if __name__ == "__main__":
    # config: hidden_size=32, num_labels=4, batch=8
    B, H, L = 8, 32, 4

    key = jax.random.PRNGKey(0)
    k_x, k_w1, k_b1, k_w2, k_b2 = jax.random.split(key, 5)

    features = jax.random.normal(k_x, (B, H), dtype=jnp.float32)
    # Parameters in kernel layout [in, out] (i.e. PyTorch weight.T)
    w_dense = jax.random.normal(k_w1, (H, H), dtype=jnp.float32) * 0.05
    b_dense = jax.random.normal(k_b1, (H,), dtype=jnp.float32) * 0.01
    w_out = jax.random.normal(k_w2, (H, L), dtype=jnp.float32) * 0.05
    b_out = jax.random.normal(k_b2, (L,), dtype=jnp.float32) * 0.01

    # One-time prep (pad + bf16 cast happens here, not per call)
    params = prepare_regression_head_params(w_dense, b_dense, w_out, b_out)

    out = regression_head(features, params)
    out = jax.block_until_ready(out)

    # Pure-JAX f32 reference (dropout = identity in eval mode). Tolerance loosened
    # because the kernel uses bf16 MXU operands (f32 accumulation).
    ref = jnp.tanh(features @ w_dense + b_dense) @ w_out + b_out
    assert out.shape == (B, L)
    err = float(jnp.max(jnp.abs(out - ref)))
    assert jnp.allclose(out, ref, atol=2e-2, rtol=2e-2), f"max abs err {err}"

    print("KERNEL_OK")
</pallas_src>

<mosaic_0001>
module attributes {stable_mosaic.version = 11 : i64} {
  func.func @regression_head_kernel(%arg0: i32, %arg1: i32, %arg2: memref<8x128xf32, #tpu.memory_space<vmem>>, %arg3: memref<128x128xbf16, #tpu.memory_space<vmem>>, %arg4: memref<1x128xf32, #tpu.memory_space<vmem>>, %arg5: memref<128x128xbf16, #tpu.memory_space<vmem>>, %arg6: memref<1x128xf32, #tpu.memory_space<vmem>>, %arg7: memref<8x128xf32, #tpu.memory_space<vmem>>, %arg8: memref<8x128xf32, #tpu.memory_space<vmem>>) attributes {dimension_semantics = [#tpu.dimension_semantics<parallel>, #tpu.dimension_semantics<arbitrary>], iteration_bounds = array<i64: 1, 1>, scalar_prefetch = 0 : i64, scratch_operands = 1 : i64, tpu.core_type = #tpu.core_type<tc>, window_params = [{transform_indices = @transform_0, window_bounds = array<i64: 8, 128>}, {pipeline_mode = #tpu.pipeline_mode<synchronous>, transform_indices = @transform_1, window_bounds = array<i64: 128, 128>}, {pipeline_mode = #tpu.pipeline_mode<synchronous>, transform_indices = @transform_2, window_bounds = array<i64: 1, 128>}, {pipeline_mode = #tpu.pipeline_mode<synchronous>, transform_indices = @transform_3, window_bounds = array<i64: 128, 128>}, {pipeline_mode = #tpu.pipeline_mode<synchronous>, transform_indices = @transform_4, window_bounds = array<i64: 1, 128>}, {transform_indices = @transform_5, window_bounds = array<i64: 8, 128>}]} {
    %c0_i32 = arith.constant 0 : i32
    %0 = arith.cmpi eq, %arg1, %c0_i32 : i32
    %1 = arith.extui %0 : i1 to i32
    %c0_i32_0 = arith.constant 0 : i32
    %2 = arith.cmpi ne, %1, %c0_i32_0 : i32
    scf.if %2 {
      %cst_10 = arith.constant 0.000000e+00 : f32
      %13 = vector.broadcast %cst_10 : f32 to vector<8x128xf32>
      %c0_11 = arith.constant 0 : index
      %c0_12 = arith.constant 0 : index
      %14 = vector.load %arg8[%c0_11, %c0_12] : memref<8x128xf32, #tpu.memory_space<vmem>>, vector<8x128xf32>
      tpu.vector_store %arg8[%c0_11, %c0_12], %13 {strides = array<i32>} : memref<8x128xf32, #tpu.memory_space<vmem>>, vector<8x128xf32>,
    } else {
    }
    %c0 = arith.constant 0 : index
    %c0_1 = arith.constant 0 : index
    %3 = vector.load %arg8[%c0, %c0_1] : memref<8x128xf32, #tpu.memory_space<vmem>>, vector<8x128xf32>
    %c0_2 = arith.constant 0 : index
    %c0_3 = arith.constant 0 : index
    %4 = vector.load %arg2[%c0_2, %c0_3] : memref<8x128xf32, #tpu.memory_space<vmem>>, vector<8x128xf32>
    %5 = arith.truncf %4 : vector<8x128xf32> to vector<8x128xbf16>
    %c0_4 = arith.constant 0 : index
    %c0_5 = arith.constant 0 : index
    %6 = vector.load %arg3[%c0_4, %c0_5] : memref<128x128xbf16, #tpu.memory_space<vmem>>, vector<128x128xbf16>
    %cst = arith.constant dense<0.000000e+00> : vector<8x128xf32>
    %7 = tpu.matmul %5, %6, %cst {dimension_numbers = #tpu.dot_dimension_numbers<[1], [0], [0], [1], [0, 0, 1, 1], [], []>} : vector<8x128xbf16>, vector<128x128xbf16>, vector<8x128xf32> -> vector<8x128xf32>
    %8 = arith.addf %3, %7 : vector<8x128xf32>
    %c0_6 = arith.constant 0 : index
    %c0_7 = arith.constant 0 : index
    %9 = vector.load %arg8[%c0_6, %c0_7] : memref<8x128xf32, #tpu.memory_space<vmem>>, vector<8x128xf32>
    tpu.vector_store %arg8[%c0_6, %c0_7], %8 {strides = array<i32>} : memref<8x128xf32, #tpu.memory_space<vmem>>, vector<8x128xf32>,
    %c0_i32_8 = arith.constant 0 : i32
    %10 = arith.cmpi eq, %arg1, %c0_i32_8 : i32
    %11 = arith.extui %10 : i1 to i32
    %c0_i32_9 = arith.constant 0 : i32
    %12 = arith.cmpi ne, %11, %c0_i32_9 : i32
    scf.if %12 {
      %c0_10 = arith.constant 0 : index
      %c0_11 = arith.constant 0 : index
      %13 = vector.load %arg8[%c0_10, %c0_11] : memref<8x128xf32, #tpu.memory_space<vmem>>, vector<8x128xf32>
      %c0_12 = arith.constant 0 : index
      %c0_13 = arith.constant 0 : index
      %14 = vector.load %arg4[%c0_12, %c0_13] : memref<1x128xf32, #tpu.memory_space<vmem>>, vector<1x128xf32>
      %15 = vector.broadcast %14 : vector<1x128xf32> to vector<8x128xf32>
      %16 = arith.addf %13, %15 : vector<8x128xf32>
      %17 = math.tanh %16 : vector<8x128xf32>
      %18 = arith.truncf %17 : vector<8x128xf32> to vector<8x128xbf16>
      %c0_14 = arith.constant 0 : index
      %c0_15 = arith.constant 0 : index
      %19 = vector.load %arg5[%c0_14, %c0_15] : memref<128x128xbf16, #tpu.memory_space<vmem>>, vector<128x128xbf16>
      %cst_16 = arith.constant dense<0.000000e+00> : vector<8x128xf32>
      %20 = tpu.matmul %18, %19, %cst_16 {dimension_numbers = #tpu.dot_dimension_numbers<[1], [0], [0], [1], [0, 0, 1, 1], [], []>} : vector<8x128xbf16>, vector<128x128xbf16>, vector<8x128xf32> -> vector<8x128xf32>
      %c0_17 = arith.constant 0 : index
      %c0_18 = arith.constant 0 : index
      %21 = vector.load %arg6[%c0_17, %c0_18] : memref<1x128xf32, #tpu.memory_space<vmem>>, vector<1x128xf32>
      %22 = vector.broadcast %21 : vector<1x128xf32> to vector<8x128xf32>
      %23 = arith.addf %20, %22 : vector<8x128xf32>
      %c0_19 = arith.constant 0 : index
      %c0_20 = arith.constant 0 : index
      %24 = vector.load %arg7[%c0_19, %c0_20] : memref<8x128xf32, #tpu.memory_space<vmem>>, vector<8x128xf32>
      tpu.vector_store %arg7[%c0_19, %c0_20], %23 {strides = array<i32>} : memref<8x128xf32, #tpu.memory_space<vmem>>, vector<8x128xf32>,
    } else {
    }
    return
  }
  func.func @transform_0(%arg0: i32, %arg1: i32) -> (i32, i32) {
    %c0_i32 = arith.constant 0 : i32
    return %arg0, %arg1 : i32, i32
  }
  func.func @transform_1(%arg0: i32, %arg1: i32) -> (i32, i32) {
    %c0_i32 = arith.constant 0 : i32
    %c0_i32_0 = arith.constant 0 : i32
    return %arg1, %c0_i32 : i32, i32
  }
  func.func @transform_2(%arg0: i32, %arg1: i32) -> (i32, i32) {
    %c0_i32 = arith.constant 0 : i32
    %c0_i32_0 = arith.constant 0 : i32
    %c0_i32_1 = arith.constant 0 : i32
    return %c0_i32, %c0_i32_0 : i32, i32
  }
  func.func @transform_3(%arg0: i32, %arg1: i32) -> (i32, i32) {
    %c0_i32 = arith.constant 0 : i32
    %c0_i32_0 = arith.constant 0 : i32
    %c0_i32_1 = arith.constant 0 : i32
    return %c0_i32, %c0_i32_0 : i32, i32
  }
  func.func @transform_4(%arg0: i32, %arg1: i32) -> (i32, i32) {
    %c0_i32 = arith.constant 0 : i32
    %c0_i32_0 = arith.constant 0 : i32
    %c0_i32_1 = arith.constant 0 : i32
    return %c0_i32, %c0_i32_0 : i32, i32
  }
  func.func @transform_5(%arg0: i32, %arg1: i32) -> (i32, i32) {
    %c0_i32 = arith.constant 0 : i32
    %c0_i32_0 = arith.constant 0 : i32
    return %arg0, %c0_i32 : i32, i32
  }
}

</mosaic_0001>

<bundles_post_ra>
// kernel: tpu_custom_call.1
= control target key start
LH: loop header
LB: loop body
LE: loop exit
PB: predicated region body
PF: predicated region fallthrough
CT: control target
= control target key end

     0   :  { %10 = vsyncpa [#allocation4], 0  ;;  %s611_s0 = inlined_call_operand.hbm [shape: f32[8,128], index: 0, kind: input, shape index: {}]   ;;  %s612_s1 = inlined_call_operand.hbm [shape: bf16[128,128], index: 1, kind: input, shape index: {}]   ;;  %s613_s2 = inlined_call_operand.vmem [shape: f32[1,128], index: 2, kind: input, shape index: {}]   ;;  %s614_s3 = inlined_call_operand.hbm [shape: bf16[128,128], index: 3, kind: input, shape index: {}]   ;;  %s615_s4 = inlined_call_operand.vmem [shape: f32[1,128], index: 4, kind: input, shape index: {}]   ;;  %s616_s5 = inlined_call_operand.hbm [shape: f32[8,128], index: 5, kind: output, shape index: {}]  }
   0x1   :  { %11 = vsyncpa [#allocation7], 0 }
   0x2   :  { %12 = vsyncpa [#allocation5], 0  ;;  %s513_s18 = smov [#allocation6]   ;;  %s419_s22 = scalar_lea.hbm %s612_s1, 1024 }
   0x3   :  { %s28_s19 = sshll.u32 %s513_s18, 4  ;;  %p420_p0 = scmp.ne.s32.totalorder %s612_s1, %s419_s22  ;;  %s29_s19 = int_to_ptr.vmem [resolvable:$true] %s28_s19 }
   0x4   :  { %p423_p1 = scmp.lt.u32.totalorder %s419_s22, %s612_s1 }
   0x6   :  { %p425_p2 = pnand %p423_p1, %p420_p0 }
   0x8   :  { %428 = shalt.err (!%p425_p2)
}
   0x9   :  { %s429_s27 = scalar_lea.vmem %s29_s19, 1024  ;;  %p434_p4 = scmp.lt.s32.totalorder %s29_s19, %s29_s19 }
   0xa   :  { %p430_p3 = scmp.ne.s32.totalorder %s29_s19, %s429_s27  ;;  %p435_p5 = scmp.lt.s32.totalorder %s429_s27, %s429_s27 }
   0xc   :  { %p436_p6 = por %p435_p5, %p434_p4 }
   0xe   :  { %p437_p7 = pnand %p436_p6, %p430_p3 }
  0x10   :  { %440 = shalt.err (!%p437_p7)
}
  0x11   :  { %s514_s28 = smov 64   ;;  %s515_s29 = smov 4  }
  0x12   :  { %34 = dma.hbm_to_vmem [thread:$0]  %s612_s1, 1024, %s29_s19, [#allocation7], %s514_s28, %s514_s28, %s515_s29  }
  0x13   :  { %s516_s7 = smov [#allocation3]   ;;  %s517_s9 = smov [#allocation8]  }
  0x14   :  { %s19_s8 = sshll.u32 %s516_s7, 4  ;;  %s42_s10 = sshll.u32 %s517_s9, 4  ;;  %s20_s8 = int_to_ptr.vmem [resolvable:$true] %s19_s8  ;;  %s43_s10 = int_to_ptr.vmem [resolvable:$true] %s42_s10 }
  0x15   :  { %s441_s13 = scalar_lea.hbm %s611_s0, 128 }
  0x16   :  { %p442_p8 = scmp.ne.s32.totalorder %s611_s0, %s441_s13  ;;  %p445_p9 = scmp.lt.u32.totalorder %s441_s13, %s611_s0 }
  0x18   :  { %p447_p10 = pnand %p445_p9, %p442_p8 }
  0x1a   :  { %450 = shalt.err (!%p447_p10)
}
  0x1b   :  { %s451_s1 = scalar_lea.vmem %s20_s8, 128  ;;  %p456_p12 = scmp.lt.s32.totalorder %s20_s8, %s20_s8 }
  0x1c   :  { %p452_p11 = scmp.ne.s32.totalorder %s20_s8, %s451_s1  ;;  %p457_p13 = scmp.lt.s32.totalorder %s451_s1, %s451_s1 }
  0x1e   :  { %p458_p0 = por %p457_p13, %p456_p12 }
  0x20   :  { %p459_p1 = pnand %p458_p0, %p452_p11 }
  0x22   :  { %462 = shalt.err (!%p459_p1)
}
  0x23   :  { %22 = dma.hbm_to_vmem [thread:$0]  %s611_s0, 128, %s20_s8, [#allocation4]  }
  0x24   :  { %s463_s22 = scalar_lea.hbm %s614_s3, 1024 }
  0x25   :  { %p464_p2 = scmp.ne.s32.totalorder %s614_s3, %s463_s22  ;;  %p467_p3 = scmp.lt.u32.totalorder %s463_s22, %s614_s3 }
  0x27   :  { %p469_p4 = pnand %p467_p3, %p464_p2 }
  0x29   :  { %472 = shalt.err (!%p469_p4)
}
  0x2a   :  { %s473_s27 = scalar_lea.vmem %s43_s10, 1024  ;;  %p478_p6 = scmp.lt.s32.totalorder %s43_s10, %s43_s10 }
  0x2b   :  { %p474_p5 = scmp.ne.s32.totalorder %s43_s10, %s473_s27  ;;  %p479_p7 = scmp.lt.s32.totalorder %s473_s27, %s473_s27 }
  0x2d   :  { %p480_p8 = por %p479_p7, %p478_p6 }
  0x2f   :  { %p481_p9 = pnand %p480_p8, %p474_p5 }
  0x31   :  { %484 = shalt.err (!%p481_p9)
}
  0x32   :  { %48 = dma.hbm_to_vmem [thread:$0]  %s614_s3, 1024, %s43_s10, [#allocation7], %s514_s28, %s514_s28, %s515_s29  }
  0x33   :  { %507 = dma.done.wait [#allocation4], 128  }
  0x34   :  { %508 = vsyncadd [#allocation4], 4294967168 }
  0x35   :  { %509 = dma.done.wait [#allocation7], 2048  }
  0x36   :  { %510 = vsyncadd [#allocation7], 4294965248  ;;  %v518_v0 = vmov 0.0   ;;  %vm519_vm0 = vmmov 0   ;;  %v401_v1 = vld [vmem:[#allocation6] sm:$0xff]   ;;  %v402_v2 = vld [vmem:[#allocation6 + $0x8] sm:$0xff]  }
  0x37   :  { %353 = vmatprep.subr.bf16.mxu0 %v518_v0  ;;  %369 = vmatprep.mubr.msk.bf16.mxu0 %vm519_vm0, %v518_v0  ;;  %v403_v3 = vld [vmem:[#allocation6 + $0x10] sm:$0xff]   ;;  %v409_v4 = vld [vmem:[#allocation8] sm:$0xff]   ;;  %v404_v5 = vld [vmem:[#allocation6 + $0x18] sm:$0xff]   ;;  %s520_s7 = smov [#allocation9]  }
  0x38   :  { %373 = vmatprep.subr.bf16.mxu1 %v518_v0  ;;  %389 = vmatprep.mubr.msk.bf16.mxu1 %vm519_vm0, %v518_v0  ;;  %v410_v6 = vld [vmem:[#allocation8 + $0x8] sm:$0xff]   ;;  %v405_v7 = vld [vmem:[#allocation6 + $0x20] sm:$0xff]   ;;  %v411_v8 = vld [vmem:[#allocation8 + $0x10] sm:$0xff]   ;;  %s307_s8 = sshll.u32 %s520_s7, 4  ;;  %s308_s8 = int_to_ptr.vmem [resolvable:$true] %s307_s8 }
  0x39   :  { %354 = vmatpush3.bf16.msra.mxu0 %v401_v1  ;;  %374 = vmatpush3.bf16.msra.mxu1 %v409_v4  ;;  %v406_v9 = vld [vmem:[#allocation6 + $0x28] sm:$0xff]   ;;  %v412_v10 = vld [vmem:[#allocation8 + $0x18] sm:$0xff]   ;;  %v407_v11 = vld [vmem:[#allocation6 + $0x30] sm:$0xff]   ;;  %p490_p11 = scmp.lt.s32.totalorder %s308_s8, %s308_s8 }
  0x3a   :  { %355 = vmatprep.subr.bf16.mxu0 %v518_v0  ;;  %375 = vmatprep.subr.bf16.mxu1 %v518_v0  ;;  %v408_v12 = vld [vmem:[#allocation6 + $0x38] sm:$0xff]   ;;  %v413_v15 = vld [vmem:[#allocation8 + $0x20] sm:$0xff]   ;;  %v414_v16 = vld [vmem:[#allocation8 + $0x28] sm:$0xff]  }
  0x3b   :  { %v67_v13 = vld [vmem:[#allocation3] sm:$0xff]  ;;  %v415_v17 = vld [vmem:[#allocation8 + $0x30] sm:$0xff]  }
  0x3c   :  { %v68_v14 = vpack.c.bf16 %v67_v13, %v67_v13  ;;  %v416_v18 = vld [vmem:[#allocation8 + $0x38] sm:$0xff]  }
  0x3d   :  { %356 = vmatpush3.bf16.msra.mxu0 %v402_v2  ;;  %376 = vmatpush3.bf16.msra.mxu1 %v410_v6  ;;  %v325_v19 = vld [vmem:[%s613_s2] ss:$0 sm:$0xff]  ;;  %s485_s2 = scalar_lea.vmem %s308_s8, 128 }
  0x3e   :  { %357 = vmatprep.subr.bf16.mxu0 %v518_v0  ;;  %377 = vmatprep.subr.bf16.mxu1 %v518_v0  ;;  %v326_v27 = vld [vmem:[%s615_s4] ss:$0 sm:$0xff]  ;;  %p486_p10 = scmp.ne.s32.totalorder %s308_s8, %s485_s2  ;;  %p491_p12 = scmp.lt.s32.totalorder %s485_s2, %s485_s2 }
  0x40   :  { %p492_p13 = por %p491_p12, %p490_p11 }
  0x41   :  { %358 = vmatpush3.bf16.msra.mxu0 %v403_v3  ;;  %378 = vmatpush3.bf16.msra.mxu1 %v411_v8 }
  0x42   :  { %359 = vmatprep.subr.bf16.mxu0 %v518_v0  ;;  %379 = vmatprep.subr.bf16.mxu1 %v518_v0  ;;  %p493_p0 = pnand %p492_p13, %p486_p10 }
  0x45   :  { %360 = vmatpush3.bf16.msra.mxu0 %v404_v5  ;;  %380 = vmatpush3.bf16.msra.mxu1 %v412_v10 }
  0x46   :  { %361 = vmatprep.subr.bf16.mxu0 %v518_v0  ;;  %381 = vmatprep.subr.bf16.mxu1 %v518_v0 }
  0x49   :  { %362 = vmatpush3.bf16.msra.mxu0 %v405_v7  ;;  %382 = vmatpush3.bf16.msra.mxu1 %v413_v15 }
  0x4a   :  { %363 = vmatprep.subr.bf16.mxu0 %v518_v0  ;;  %383 = vmatprep.subr.bf16.mxu1 %v518_v0 }
  0x4d   :  { %364 = vmatpush3.bf16.msra.mxu0 %v406_v9  ;;  %384 = vmatpush3.bf16.msra.mxu1 %v414_v16 }
  0x4e   :  { %365 = vmatprep.subr.bf16.mxu0 %v518_v0  ;;  %385 = vmatprep.subr.bf16.mxu1 %v518_v0 }
  0x51   :  { %366 = vmatpush3.bf16.msra.mxu0 %v407_v11  ;;  %386 = vmatpush3.bf16.msra.mxu1 %v415_v17 }
  0x52   :  { %367 = vmatprep.subr.bf16.mxu0 %v518_v0  ;;  %387 = vmatprep.subr.bf16.mxu1 %v518_v0 }
  0x55   :  { %368 = vmatpush3.bf16.msra.mxu0 %v408_v12  ;;  %388 = vmatpush3.bf16.msra.mxu1 %v416_v18 }
  0x58   :  { %370 = vmatmul.mubr.bf16.vlgmr.msra.gmra.mrb[0].mxu0 %v68_v14 }
 0x12b   :  { %v167_v20 = vpop.f32.mrb[0].mxu0 }
 0x12c   :  { %v186_v21 = vadd.f32 %v325_v19, %v167_v20  ;;  %v371_v22 = vpop.f32.mrb[1].mxu0 }
 0x12d   :  { %v170_v23 = vpop.f32.mrb[2].mxu0 }
 0x12e   :  { %417 = vtanh.f32 %v186_v21  ;;  %v372_v24 = vpop.f32.mrb[3].mxu0 }
 0x138   :  { %v418_v25 = vpop.eup %417 }
 0x139   :  { %v188_v26 = vpack.c.bf16 %v418_v25, %v418_v25 }
 0x13b   :  { %390 = vmatmul.mubr.bf16.vlgmr.msra.gmra.mrb[0].mxu1 %v188_v26 }
 0x20e   :  { %v294_v28 = vpop.f32.mrb[0].mxu1 }
 0x20f   :  { %v295_v29 = vadd.f32 %v326_v27, %v294_v28  ;;  %v391_v30 = vpop.f32.mrb[1].mxu1 }
 0x210   :  { %v297_v31 = vpop.f32.mrb[2].mxu1 }
 0x211   :  { %300 = vst [vmem:[#allocation9] sm:$0xff] %v295_v29  ;;  %v392_v32 = vpop.f32.mrb[3].mxu1 }
 0x212   :  { %496 = shalt.err (!%p493_p0)
}
 0x213   :  { %s497_s4 = scalar_lea.hbm %s616_s5, 128 }
 0x214   :  { %p498_p1 = scmp.ne.s32.totalorder %s616_s5, %s497_s4  ;;  %p501_p2 = scmp.lt.u32.totalorder %s497_s4, %s616_s5 }
 0x216   :  { %p503_p3 = pnand %p501_p2, %p498_p1 }
 0x218   :  { %506 = shalt.err (!%p503_p3)
}
 0x219   :  { %310 = dma.vmem_to_hbm [thread:$0]  %s308_s8, 128, %s616_s5, [#allocation5]  }
 0x21a   :  { %511 = dma.done.wait [#allocation5], 128  }
 0x21b   :  { %512 = vsyncadd [#allocation5], 4294967168 }
 0x21c   :  { %314 = vsyncpa [#allocation4], 1 }
 0x21d   :  { %315 = vsyncpa [#allocation7], 1 }
 0x21e   :  { %316 = vsyncpa [#allocation5], 1 }

</bundles_post_ra>
